<compile_context>
chip_gen: v7x
topology: tpu7x:2x2x1
jax: 0.10.0
libtpu: 0.0.40
codegen_flags: <defaults>
</compile_context>

<pallas_src>
import functools

import jax
import jax.numpy as jnp
from jax import lax
from jax.experimental import pallas as pl
from jax.experimental.pallas import tpu as pltpu


def _round_up(v, m):
    return (v + m - 1) // m * m


def _cdiv(a, b):
    return -(-a // b)


def _dist_maps_kernel(pts_ref, o_ref, *, num_points, inv_rs):
    # pts_ref: SMEM 1-D f32[N * 2*num_points * 3]; per click: [a, b, bias] with
    #          a = y_p/R, b = x_p/R (0 if invalid), bias = 0 (valid) / 1e6 (invalid).
    # o_ref:   VMEM (1, 2, TH, W) f32 output tile.
    n = pl.program_id(0)
    hb = pl.program_id(1)
    th = o_ref.shape[2]
    w = o_ref.shape[3]

    # 1-D normalized coordinate vectors (broadcast-ready); no full-tile grid ops.
    row_v = (lax.broadcasted_iota(jnp.int32, (th, 1), 0) + hb * th
             ).astype(jnp.float32) * inv_rs                     # (TH, 1) : r/(R*s)
    col_v = lax.broadcasted_iota(jnp.int32, (1, w), 1
                                 ).astype(jnp.float32) * inv_rs  # (1, W)  : c/(R*s)

    for g in range(2):                                  # positive / negative clicks
        base = (n * 2 + g) * (num_points * 3)
        dmin = None
        for p in range(num_points):                     # static unroll (small)
            a = pts_ref[base + 3 * p + 0]
            b = pts_ref[base + 3 * p + 1]
            bias = pts_ref[base + 3 * p + 2]
            dr = row_v - a                              # (TH,1) cheap vector ops
            dc = col_v - b                              # (1,W)
            rterm = dr * dr + bias                      # (TH,1)
            cterm = dc * dc                             # (1,W)
            d = rterm + cterm                           # 1 full-tile broadcast-add
            dmin = d if dmin is None else jnp.minimum(dmin, d)   # 1 full-tile min
        o_ref[0, g, :, :] = jnp.tanh(2.0 * jnp.sqrt(dmin))


def _choose_row_tile(H, W, N):
    """Pick (TH, n_h_tiles): big enough to amortize per-step overhead, small
    enough for VMEM, minimal tail waste, and enough grid steps for megacore."""
    if H <= 8:
        return H, 1                              # full-H block (equals full dim)
    row_bytes = 2 * W * 4                        # both channels, f32, one row
    cap_bytes = 4 * 1024 * 1024                  # double-buffered: 8 MiB < v5e's 16 MiB
    th_cap = (cap_bytes // row_bytes) // 8 * 8
    if th_cap <= 0:
        th_cap = 8                               # degenerate: extremely wide images
    th_cap = min(th_cap, _round_up(H, 8))
    n_h = _cdiv(H, th_cap)
    # Ensure several parallel grid steps (v7x: 2 TCs; also deepens the pipeline).
    min_steps = 4
    if N * n_h < min_steps:
        n_h = max(n_h, min(_cdiv(H, 8), _cdiv(min_steps, N)))
    th = _round_up(_cdiv(H, n_h), 8)
    n_h = _cdiv(H, th)
    return th, n_h


def dist_maps(x, points, norm_radius, spatial_scale=1.0):
    """x: (N, C, H, W) (shape only); points: (N, 2*num_points, 2) float."""
    N, _, H, W = x.shape
    assert points.shape[0] == N and points.shape[-1] == 2
    P = points.shape[1]
    num_points = P // 2
    assert num_points >= 1 and 2 * num_points == P

    inv_rs = 1.0 / (float(norm_radius) * float(spatial_scale))

    # Tiny per-click table -> 1-D SMEM (no SMEM tile padding).
    # Invalid clicks: coords zeroed, additive bias 1e6 (output-identical after tanh).
    pts = points.astype(jnp.float32)
    invalid = jnp.max(pts, axis=-1) < 0                                 # (N, P)
    scale = float(spatial_scale) * inv_rs                               # = 1/R
    a = jnp.where(invalid, 0.0, pts[..., 0] * scale)
    b = jnp.where(invalid, 0.0, pts[..., 1] * scale)
    bias = jnp.where(invalid, 1e6, 0.0).astype(jnp.float32)
    packed = jnp.stack([a, b, bias], axis=-1).reshape(-1)               # (N*P*3,)

    th, n_h = _choose_row_tile(H, W, N)
    grid = (N, n_h)

    out = pl.pallas_call(
        functools.partial(_dist_maps_kernel, num_points=num_points, inv_rs=inv_rs),
        out_shape=jax.ShapeDtypeStruct((N, 2, H, W), jnp.float32),
        grid=grid,
        in_specs=[pl.BlockSpec(memory_space=pltpu.MemorySpace.SMEM)],
        out_specs=pl.BlockSpec((1, 2, th, W), lambda n, h: (n, 0, h, 0)),
        compiler_params=pltpu.CompilerParams(
            dimension_semantics=("parallel", "parallel")),
        cost_estimate=pl.CostEstimate(
            flops=int(N * 2 * H * W * (2 * num_points + 1)),
            transcendentals=int(N * 2 * H * W * 2),
            bytes_accessed=int(N * 2 * H * W * 4 + packed.size * 4)),
    )(packed)

    return out


def dist_maps_reference(x, points, norm_radius, spatial_scale=1.0):
    """Pure-JAX mirror of the PyTorch (non-cpu_mode) forward."""
    N, _, H, W = x.shape
    P = points.shape[1]
    num_points = P // 2
    pts = points.reshape(-1, 2).astype(jnp.float32)                     # (N*P, 2)
    invalid = jnp.max(pts, axis=1) < 0
    rows = jnp.arange(H, dtype=jnp.float32)
    cols = jnp.arange(W, dtype=jnp.float32)
    cr, cc = jnp.meshgrid(rows, cols, indexing="ij")
    coords = jnp.broadcast_to(jnp.stack([cr, cc], axis=0)[None],
                              (pts.shape[0], 2, H, W))
    add_xy = (pts * spatial_scale).reshape(-1, 2, 1, 1)
    coords = (coords - add_xy) / (norm_radius * spatial_scale)
    coords = coords * coords
    d = coords[:, 0] + coords[:, 1]                                     # (N*P, H, W)
    d = jnp.where(invalid[:, None, None], 1e6, d)
    d = d.reshape(N * 2, num_points, H, W).min(axis=1).reshape(N, 2, H, W)
    return jnp.tanh(2.0 * jnp.sqrt(d))


if __name__ == "__main__":
    key = jax.random.PRNGKey(0)

    # Test 1: small aligned shape.
    k_x, k_p = jax.random.split(key)
    N, C, H, W = 2, 4, 16, 16
    num_points = 2
    norm_radius, spatial_scale = 8.0, 1.0
    x = jax.random.normal(k_x, (N, C, H, W), dtype=jnp.float32)
    points = jax.random.uniform(k_p, (N, 2 * num_points, 2),
                                minval=0.0, maxval=float(H) - 1.0,
                                dtype=jnp.float32)
    points = points.at[0, 3].set(jnp.array([-1.0, -1.0], dtype=jnp.float32))
    points = points.at[1, 1].set(jnp.array([-1.0, -1.0], dtype=jnp.float32))
    out = jax.block_until_ready(dist_maps(x, points, norm_radius, spatial_scale))
    ref = dist_maps_reference(x, points, norm_radius, spatial_scale)
    assert out.shape == (N, 2, H, W)
    assert jnp.allclose(out, ref, atol=1e-4, rtol=1e-4), \
        float(jnp.max(jnp.abs(out - ref)))

    # Test 2: non-tile-aligned H/W and N==1 exercises the masked-tail store path
    # and the forced multi-step parallel grid.
    k_x2, k_p2 = jax.random.split(jax.random.PRNGKey(1))
    N2, C2, H2, W2 = 1, 3, 13, 20
    num_points2 = 3
    x2 = jax.random.normal(k_x2, (N2, C2, H2, W2), dtype=jnp.float32)
    points2 = jax.random.uniform(k_p2, (N2, 2 * num_points2, 2),
                                 minval=0.0, maxval=float(max(H2, W2)) - 1.0,
                                 dtype=jnp.float32)
    points2 = points2.at[0, 4].set(jnp.array([-1.0, -1.0], dtype=jnp.float32))
    out2 = jax.block_until_ready(dist_maps(x2, points2, norm_radius, spatial_scale))
    ref2 = dist_maps_reference(x2, points2, norm_radius, spatial_scale)
    assert out2.shape == (N2, 2, H2, W2)
    assert jnp.allclose(out2, ref2, atol=1e-4, rtol=1e-4), \
        float(jnp.max(jnp.abs(out2 - ref2)))

    print("KERNEL_OK")
</pallas_src>

<mosaic_0001>
module attributes {stable_mosaic.version = 11 : i64} {
  func.func @_dist_maps_kernel(%arg0: i32, %arg1: i32, %arg2: memref<24xf32, #tpu.memory_space<smem>>, %arg3: memref<1x2x8x16xf32, #tpu.memory_space<vmem>>) attributes {dimension_semantics = [#tpu.dimension_semantics<parallel>, #tpu.dimension_semantics<parallel>], iteration_bounds = array<i64: 2, 2>, scalar_prefetch = 0 : i64, scratch_operands = 0 : i64, tpu.core_type = #tpu.core_type<tc>, window_params = [{transform_indices = @transform_0, window_bounds = array<i64: 24>}, {transform_indices = @transform_1, window_bounds = array<i64: 1, 2, 8, 16>}]} {
    %0 = tpu.iota {dimensions = array<i32: 0>} : vector<8x1xi32>
    %c8_i32 = arith.constant 8 : i32
    %1 = arith.muli %arg1, %c8_i32 : i32
    %2 = vector.broadcast %1 : i32 to vector<8x1xi32>
    %3 = arith.addi %0, %2 : vector<8x1xi32>
    %4 = arith.sitofp %3 : vector<8x1xi32> to vector<8x1xf32>
    %cst = arith.constant 1.250000e-01 : f32
    %5 = vector.broadcast %cst : f32 to vector<8x1xf32>
    %6 = arith.mulf %4, %5 : vector<8x1xf32>
    %7 = tpu.iota {dimensions = array<i32: 1>} : vector<1x16xi32>
    %8 = arith.sitofp %7 : vector<1x16xi32> to vector<1x16xf32>
    %cst_0 = arith.constant 1.250000e-01 : f32
    %9 = vector.broadcast %cst_0 : f32 to vector<1x16xf32>
    %10 = arith.mulf %8, %9 : vector<1x16xf32>
    %c2_i32 = arith.constant 2 : i32
    %11 = arith.muli %arg0, %c2_i32 : i32
    %c0_i32 = arith.constant 0 : i32
    %12 = arith.addi %11, %c0_i32 : i32
    %c6_i32 = arith.constant 6 : i32
    %13 = arith.muli %12, %c6_i32 : i32
    %c0_i32_1 = arith.constant 0 : i32
    %14 = arith.addi %13, %c0_i32_1 : i32
    %c0_i32_2 = arith.constant 0 : i32
    %15 = arith.addi %14, %c0_i32_2 : i32
    %16 = arith.index_cast %15 : i32 to index
    %17 = memref.load %arg2[%16] : memref<24xf32, #tpu.memory_space<smem>>
    %c0_i32_3 = arith.constant 0 : i32
    %18 = arith.addi %13, %c0_i32_3 : i32
    %c1_i32 = arith.constant 1 : i32
    %19 = arith.addi %18, %c1_i32 : i32
    %20 = arith.index_cast %19 : i32 to index
    %21 = memref.load %arg2[%20] : memref<24xf32, #tpu.memory_space<smem>>
    %c0_i32_4 = arith.constant 0 : i32
    %22 = arith.addi %13, %c0_i32_4 : i32
    %c2_i32_5 = arith.constant 2 : i32
    %23 = arith.addi %22, %c2_i32_5 : i32
    %24 = arith.index_cast %23 : i32 to index
    %25 = memref.load %arg2[%24] : memref<24xf32, #tpu.memory_space<smem>>
    %26 = vector.broadcast %17 : f32 to vector<8x1xf32>
    %27 = arith.subf %6, %26 : vector<8x1xf32>
    %28 = vector.broadcast %21 : f32 to vector<1x16xf32>
    %29 = arith.subf %10, %28 : vector<1x16xf32>
    %30 = arith.mulf %27, %27 : vector<8x1xf32>
    %31 = vector.broadcast %25 : f32 to vector<8x1xf32>
    %32 = arith.addf %30, %31 : vector<8x1xf32>
    %33 = arith.mulf %29, %29 : vector<1x16xf32>
    %34 = vector.broadcast %32 : vector<8x1xf32> to vector<8x16xf32>
    %35 = vector.broadcast %33 : vector<1x16xf32> to vector<8x16xf32>
    %36 = arith.addf %34, %35 : vector<8x16xf32>
    %c3_i32 = arith.constant 3 : i32
    %37 = arith.addi %13, %c3_i32 : i32
    %c0_i32_6 = arith.constant 0 : i32
    %38 = arith.addi %37, %c0_i32_6 : i32
    %39 = arith.index_cast %38 : i32 to index
    %40 = memref.load %arg2[%39] : memref<24xf32, #tpu.memory_space<smem>>
    %c3_i32_7 = arith.constant 3 : i32
    %41 = arith.addi %13, %c3_i32_7 : i32
    %c1_i32_8 = arith.constant 1 : i32
    %42 = arith.addi %41, %c1_i32_8 : i32
    %43 = arith.index_cast %42 : i32 to index
    %44 = memref.load %arg2[%43] : memref<24xf32, #tpu.memory_space<smem>>
    %c3_i32_9 = arith.constant 3 : i32
    %45 = arith.addi %13, %c3_i32_9 : i32
    %c2_i32_10 = arith.constant 2 : i32
    %46 = arith.addi %45, %c2_i32_10 : i32
    %47 = arith.index_cast %46 : i32 to index
    %48 = memref.load %arg2[%47] : memref<24xf32, #tpu.memory_space<smem>>
    %49 = vector.broadcast %40 : f32 to vector<8x1xf32>
    %50 = arith.subf %6, %49 : vector<8x1xf32>
    %51 = vector.broadcast %44 : f32 to vector<1x16xf32>
    %52 = arith.subf %10, %51 : vector<1x16xf32>
    %53 = arith.mulf %50, %50 : vector<8x1xf32>
    %54 = vector.broadcast %48 : f32 to vector<8x1xf32>
    %55 = arith.addf %53, %54 : vector<8x1xf32>
    %56 = arith.mulf %52, %52 : vector<1x16xf32>
    %57 = vector.broadcast %55 : vector<8x1xf32> to vector<8x16xf32>
    %58 = vector.broadcast %56 : vector<1x16xf32> to vector<8x16xf32>
    %59 = arith.addf %57, %58 : vector<8x16xf32>
    %60 = arith.minimumf %36, %59 : vector<8x16xf32>
    %61 = math.sqrt %60 : vector<8x16xf32>
    %cst_11 = arith.constant 2.000000e+00 : f32
    %62 = vector.broadcast %cst_11 : f32 to vector<8x16xf32>
    %63 = arith.mulf %62, %61 : vector<8x16xf32>
    %64 = math.tanh %63 : vector<8x16xf32>
    %c0 = arith.constant 0 : index
    %c0_12 = arith.constant 0 : index
    %c0_13 = arith.constant 0 : index
    %c0_14 = arith.constant 0 : index
    %65 = vector.load %arg3[%c0, %c0_12, %c0_13, %c0_14] : memref<1x2x8x16xf32, #tpu.memory_space<vmem>>, vector<1x1x8x16xf32>
    %66 = vector.shape_cast %65 : vector<1x1x8x16xf32> to vector<8x16xf32>
    %67 = vector.shape_cast %64 : vector<8x16xf32> to vector<1x1x8x16xf32>
    tpu.vector_store %arg3[%c0, %c0_12, %c0_13, %c0_14], %67 {strides = array<i32>} : memref<1x2x8x16xf32, #tpu.memory_space<vmem>>, vector<1x1x8x16xf32>,
    %c2_i32_15 = arith.constant 2 : i32
    %68 = arith.muli %arg0, %c2_i32_15 : i32
    %c1_i32_16 = arith.constant 1 : i32
    %69 = arith.addi %68, %c1_i32_16 : i32
    %c6_i32_17 = arith.constant 6 : i32
    %70 = arith.muli %69, %c6_i32_17 : i32
    %c0_i32_18 = arith.constant 0 : i32
    %71 = arith.addi %70, %c0_i32_18 : i32
    %c0_i32_19 = arith.constant 0 : i32
    %72 = arith.addi %71, %c0_i32_19 : i32
    %73 = arith.index_cast %72 : i32 to index
    %74 = memref.load %arg2[%73] : memref<24xf32, #tpu.memory_space<smem>>
    %c0_i32_20 = arith.constant 0 : i32
    %75 = arith.addi %70, %c0_i32_20 : i32
    %c1_i32_21 = arith.constant 1 : i32
    %76 = arith.addi %75, %c1_i32_21 : i32
    %77 = arith.index_cast %76 : i32 to index
    %78 = memref.load %arg2[%77] : memref<24xf32, #tpu.memory_space<smem>>
    %c0_i32_22 = arith.constant 0 : i32
    %79 = arith.addi %70, %c0_i32_22 : i32
    %c2_i32_23 = arith.constant 2 : i32
    %80 = arith.addi %79, %c2_i32_23 : i32
    %81 = arith.index_cast %80 : i32 to index
    %82 = memref.load %arg2[%81] : memref<24xf32, #tpu.memory_space<smem>>
    %83 = vector.broadcast %74 : f32 to vector<8x1xf32>
    %84 = arith.subf %6, %83 : vector<8x1xf32>
    %85 = vector.broadcast %78 : f32 to vector<1x16xf32>
    %86 = arith.subf %10, %85 : vector<1x16xf32>
    %87 = arith.mulf %84, %84 : vector<8x1xf32>
    %88 = vector.broadcast %82 : f32 to vector<8x1xf32>
    %89 = arith.addf %87, %88 : vector<8x1xf32>
    %90 = arith.mulf %86, %86 : vector<1x16xf32>
    %91 = vector.broadcast %89 : vector<8x1xf32> to vector<8x16xf32>
    %92 = vector.broadcast %90 : vector<1x16xf32> to vector<8x16xf32>
    %93 = arith.addf %91, %92 : vector<8x16xf32>
    %c3_i32_24 = arith.constant 3 : i32
    %94 = arith.addi %70, %c3_i32_24 : i32
    %c0_i32_25 = arith.constant 0 : i32
    %95 = arith.addi %94, %c0_i32_25 : i32
    %96 = arith.index_cast %95 : i32 to index
    %97 = memref.load %arg2[%96] : memref<24xf32, #tpu.memory_space<smem>>
    %c3_i32_26 = arith.constant 3 : i32
    %98 = arith.addi %70, %c3_i32_26 : i32
    %c1_i32_27 = arith.constant 1 : i32
    %99 = arith.addi %98, %c1_i32_27 : i32
    %100 = arith.index_cast %99 : i32 to index
    %101 = memref.load %arg2[%100] : memref<24xf32, #tpu.memory_space<smem>>
    %c3_i32_28 = arith.constant 3 : i32
    %102 = arith.addi %70, %c3_i32_28 : i32
    %c2_i32_29 = arith.constant 2 : i32
    %103 = arith.addi %102, %c2_i32_29 : i32
    %104 = arith.index_cast %103 : i32 to index
    %105 = memref.load %arg2[%104] : memref<24xf32, #tpu.memory_space<smem>>
    %106 = vector.broadcast %97 : f32 to vector<8x1xf32>
    %107 = arith.subf %6, %106 : vector<8x1xf32>
    %108 = vector.broadcast %101 : f32 to vector<1x16xf32>
    %109 = arith.subf %10, %108 : vector<1x16xf32>
    %110 = arith.mulf %107, %107 : vector<8x1xf32>
    %111 = vector.broadcast %105 : f32 to vector<8x1xf32>
    %112 = arith.addf %110, %111 : vector<8x1xf32>
    %113 = arith.mulf %109, %109 : vector<1x16xf32>
    %114 = vector.broadcast %112 : vector<8x1xf32> to vector<8x16xf32>
    %115 = vector.broadcast %113 : vector<1x16xf32> to vector<8x16xf32>
    %116 = arith.addf %114, %115 : vector<8x16xf32>
    %117 = arith.minimumf %93, %116 : vector<8x16xf32>
    %118 = math.sqrt %117 : vector<8x16xf32>
    %cst_30 = arith.constant 2.000000e+00 : f32
    %119 = vector.broadcast %cst_30 : f32 to vector<8x16xf32>
    %120 = arith.mulf %119, %118 : vector<8x16xf32>
    %121 = math.tanh %120 : vector<8x16xf32>
    %c0_31 = arith.constant 0 : index
    %c1 = arith.constant 1 : index
    %c0_32 = arith.constant 0 : index
    %c0_33 = arith.constant 0 : index
    %122 = vector.load %arg3[%c0_31, %c1, %c0_32, %c0_33] : memref<1x2x8x16xf32, #tpu.memory_space<vmem>>, vector<1x1x8x16xf32>
    %123 = vector.shape_cast %122 : vector<1x1x8x16xf32> to vector<8x16xf32>
    %124 = vector.shape_cast %121 : vector<8x16xf32> to vector<1x1x8x16xf32>
    tpu.vector_store %arg3[%c0_31, %c1, %c0_32, %c0_33], %124 {strides = array<i32>} : memref<1x2x8x16xf32, #tpu.memory_space<vmem>>, vector<1x1x8x16xf32>,
    return
  }
  func.func @transform_0(%arg0: i32, %arg1: i32) -> i32 {
    %c0_i32 = arith.constant 0 : i32
    %c0_i32_0 = arith.constant 0 : i32
    return %c0_i32 : i32
  }
  func.func @transform_1(%arg0: i32, %arg1: i32) -> (i32, i32, i32, i32) {
    %c0_i32 = arith.constant 0 : i32
    %c0_i32_0 = arith.constant 0 : i32
    %c0_i32_1 = arith.constant 0 : i32
    return %arg0, %c0_i32, %arg1, %c0_i32_0 : i32, i32, i32, i32
  }
}

</mosaic_0001>

<bundles_post_ra>
// kernel: tpu_custom_call.1
= control target key start
LH: loop header
LB: loop body
LE: loop exit
PB: predicated region body
PF: predicated region fallthrough
CT: control target
= control target key end

     0   :  { %6 = vsyncpa [#allocation4], 0  ;;  %s710_s0 = inlined_call_operand.hbm [shape: f32[24], index: 0, kind: input, shape index: {}]   ;;  %s711_s1 = inlined_call_operand.hbm [shape: f32[2,2,16,16], index: 1, kind: output, shape index: {}]  }
   0x1   :  { %7 = vsyncpa [#allocation3], 0 }
   0x2   :  { %9 = vsyncpa [#allocation3 + $0x1], 0  ;;  %s544_s6 = smov 0   ;;  %s546_s7 = smov 0  }
   0x3   :  { %s548_s8 = smov 0   ;;  %s550_s9 = smov 0  }
   0x4   :  { %s552_s10 = smov 0   ;;  %s554_s11 = smov 0  }
   0x5   :  { %s556_s12 = smov 0   ;;  %s558_s13 = smov 0  }
   0x6 LB: > { %s308_s14 = sadd.s32 4294967295, %s527_s13   ;;  %s309_s15 = sadd.s32 4294967294, %s527_s13   ;;  %s527_s13 = sphi %s558_s13, %s15_s13   ;;  %s523_s12 = sphi %s556_s12, %s722_s12   ;;  %s519_s11 = sphi %s554_s11, %s721_s11   ;;  %s515_s10 = sphi %s552_s10, %s720_s10   ;;  %s511_s9 = sphi %s550_s9, %s719_s9   ;;  %s507_s8 = sphi %s548_s8, %s718_s8   ;;  %s503_s7 = sphi %s546_s7, %s717_s7   ;;  %s499_s6 = sphi %s544_s6, %s716_s6  }
   0x7   : > { %s24_s16 = sadd.s32 1, %s519_s11  ;;  %s27_s17 = sadd.s32 1, %s523_s12 }
   0x8   : > { %p25_p0 = scmp.ge.s32.totalorder %s24_s16, 2  ;;  %s57_s18 = sadd.s32 1, %s507_s8 }
   0x9   : > { %p67_p1 = scmp.ne.s32.totalorder %s507_s8, %s503_s7  ;;  %p68_p2 = scmp.eq.s32.totalorder %s308_s14, 3 }
   0xa   : > { %s724_s16 = smov (%p25_p0, %s24_s16), 0  ;;  %s726_s17 = smov (!%p25_p0, %s27_s17), %s523_s12 }
   0xb   : > { %s53_s19 = ssub.s32 %s519_s11, %s724_s16  ;;  %p596_p3 = por %p68_p2, %p67_p1 }
   0xc   : > { %p29_p4 = scmp.ge.s32.totalorder %s726_s17, 2  ;;  %p73_p5 = scmp.ne.s32.totalorder %s503_s7, %s499_s6 }
   0xd   : > { %p74_p6 = scmp.eq.s32.totalorder %s309_s15, 3  ;;  %p310_p7 = scmp.ge.s32.totalorder %s527_s13, 1 }
   0xe   : > { %s728_s17 = smov (%p29_p4, %s726_s17), 0  ;;  %p81_p9 = scmp.lt.s32.totalorder %s527_s13, 5 }
   0xf   : > { %p605_p8 = por %p74_p6, %p73_p5  ;;  %s52_s22 = ssub.s32 %s523_s12, %s728_s17 }
  0x10   : > { %s54_s23 = sor.u32 %s53_s19, %s52_s22  ;;  %p612_p10 = pnand %p310_p7, %p81_p9 }
  0x11   : > { %p55_p11 = scmp.eq.s32.totalorder %s54_s23, 0  ;;  %p616_p12 = scmp.eq.s32.totalorder %s308_s14, 0 }
  0x12   : > { %p329_p13 = pneg %p612_p10  ;;  %s416_s29 = scalar_lea.hbm %s710_s0, 16 }
  0x13   : > { %s623_s26 = scalar_select %p55_p11, %s507_s8, %s57_s18  }
  0x14   : > { %p330_p0 = pnand %p616_p12, %p329_p13  ;;  %p417_p1 = scmp.ne.s32.totalorder %s710_s0, %s416_s29 }
  0x15   : > { %p423_p6 = scmp.lt.u32.totalorder %s416_s29, %s710_s0 }
  0x16   : > { %p418_p2 = pneg %p330_p0 }
  0x18   : > { %p419_p4 = pnand %p418_p2, %p417_p1 }
  0x1a   : > { %p420_p5 = pneg %p419_p4 }
  0x1c   : > { %p425_p7 = pnand %p423_p6, %p420_p5 }
  0x1e   : > { %428 = shalt.err (!%p425_p7)
}
  0x1f   : > { %s529_s5 = smov [#allocation2]   ;;  %105 = sbr.rel (%p612_p10) target bundleno = 115 (0x73), region = 24 }
  0x20   : > { %332 = dma.hbm_to_smem (!%p330_p0), %s710_s0, 16, %s529_s5, [#allocation4]  }
  0x26   : > { %490 = dma.done.wait (%p616_p12), [#allocation4], 16  }
  0x27   : > { %492 = vsyncadd (%p616_p12), [#allocation4], 4294967280 }
  0x28   : > { %111 = sfence }
  0x29   : > { %v121_v0 = vlaneseq  ;;  %s315_s18 = sshll.u32 %s511_s9, 3  ;;  %s132_s19 = smul.u32 12, %s515_s10  ;;  %vm172_vm4 = vcmask 130048  }
  0x2a   : > { %v124_v1 = vstv %s315_s18  ;;  %s316_s5 = sshll.u32 %s515_s10, 1 }
  0x2b   : > { %v122_v2 = vshrl.u32 %v121_v0, 7  ;;  %v129_v3 = vand.u32 127, %v121_v0  ;;  %s133_s22 = sld [smem:[#allocation2 + %s132_s19]]  ;;  %s134_s23 = sadd.s32 1, %s132_s19 }
  0x2c   : > { %s135_s24 = sld [smem:[#allocation2 + %s134_s23]]  ;;  %s136_s27 = sadd.s32 2, %s132_s19 }
  0x2d   : > { %v125_v4 = vadd.s32 %v124_v1, %v122_v2  ;;  %v130_v5 = vcvt.s32.f32 %v129_v3  ;;  %s137_s28 = sld [smem:[#allocation2 + %s136_s27]]  ;;  %s147_s29 = sadd.s32 3, %s132_s19 }
  0x2e   : > { %s148_s25 = sld [smem:[#allocation2 + %s147_s29]]  ;;  %s149_s30 = sadd.s32 4, %s132_s19 }
  0x2f   : > { %v126_v6 = vcvt.s32.f32 %v125_v4  ;;  %v131_v7 = vmul.f32 0.125, %v130_v5  ;;  %s150_s2 = sld [smem:[#allocation2 + %s149_s30]]  ;;  %s151_s3 = sadd.s32 5, %s132_s19 }
  0x30   : > { %s152_s4 = sld [smem:[#allocation2 + %s151_s3]]  ;;  %s175_s14 = sadd.s32 1, %s316_s5 }
  0x31   : > { %v127_v8 = vmul.f32 0.125, %v126_v6  ;;  %v138_v9 = vstv %s133_s22  ;;  %s176_s15 = smul.u32 6, %s175_s14  ;;  %s319_s5 = sshll.u32 %s515_s10, 2 }
  0x32   : > { %v140_v11 = vstv %s135_s24 }
  0x33   : > { %v139_v10 = vsub.f32 %v127_v8, %v138_v9  ;;  %v141_v12 = vsub.f32 %v131_v7, %v140_v11  ;;  %v143_v13 = vstv %s137_s28  ;;  %s177_s18 = sld [smem:[#allocation2 + %s176_s15]]  ;;  %s178_s23 = sadd.s32 1, %s176_s15 }
  0x34   : > { %v153_v15 = vstv %s148_s25  ;;  %s179_s19 = sld [smem:[#allocation2 + %s178_s23]]  ;;  %s180_s27 = sadd.s32 2, %s176_s15 }
  0x35   : > { %v142_v14 = vmul.f32 %v139_v10, %v139_v10  ;;  %v145_v16 = vmul.f32 %v141_v12, %v141_v12  ;;  %v154_v17 = vsub.f32 %v127_v8, %v153_v15  ;;  %v155_v18 = vstv %s150_s2  ;;  %s181_s22 = sld [smem:[#allocation2 + %s180_s27]]  ;;  %s191_s29 = sadd.s32 3, %s176_s15 }
  0x36   : > { %v156_v20 = vsub.f32 %v131_v7, %v155_v18  ;;  %v158_v21 = vstv %s152_s4  ;;  %s192_s24 = sld [smem:[#allocation2 + %s191_s29]]  ;;  %s193_s30 = sadd.s32 4, %s176_s15 }
  0x37   : > { %v144_v19 = vadd.f32 %v143_v13, %v142_v14  ;;  %v157_v22 = vmul.f32 %v154_v17, %v154_v17  ;;  %s194_s28 = sld [smem:[#allocation2 + %s193_s30]]  ;;  %s195_s25 = sadd.s32 5, %s176_s15 }
  0x38   : > { %v160_v23 = vmul.f32 %v156_v20, %v156_v20  ;;  %s196_s3 = sld [smem:[#allocation2 + %s195_s25]]  ;;  %s118_s2 = sand.u32 1, %s503_s7  }
  0x39   : > { %v146_v24 = vadd.f32 %v145_v16, %v144_v19  ;;  %v159_v25 = vadd.f32 %v158_v21, %v157_v22  ;;  %v182_v27 = vstv %s177_s18  ;;  %s314_s4 = sshll.u32 %s118_s2, 4  ;;  %s230_s15 = sadd.s32 %s511_s9, %s319_s5 }
  0x3a   : > { %v183_v28 = vsub.f32 %v127_v8, %v182_v27  ;;  %v184_v29 = vstv %s179_s19  ;;  %s120_s14 = scalar_lea.vmem [#allocation5], %s314_s4  ;;  %s320_s23 = sshll.u32 %s230_s15, 7 }
  0x3b   : > { %v161_v26 = vadd.f32 %v160_v23, %v159_v25  ;;  %v185_v31 = vsub.f32 %v131_v7, %v184_v29  ;;  %v187_v32 = vstv %s181_s22  ;;  %s233_s18 = sshll.u32 %s120_s14, 4  ;;  %s656_s22 = scalar_lea.hbm %s711_s1, %s320_s23  ;;  %s651_s18 = int_to_ptr.vmem [resolvable:$true] %s233_s18 }
  0x3c   : > { %v186_v33 = vmul.f32 %v183_v28, %v183_v28  ;;  %v197_v34 = vstv %s192_s24  ;;  %s658_s29 = scalar_lea.sflag [#allocation3], %s118_s2  ;;  %s429_s10 = scalar_lea.vmem %s651_s18, 256 }
  0x3d   : > { %v162_v30 = vmin.f32 %v146_v24, %v161_v26  ;;  %v189_v36 = vmul.f32 %v185_v31, %v185_v31  ;;  %v198_v37 = vsub.f32 %v127_v8, %v197_v34  ;;  %v199_v38 = vstv %s194_s28  ;;  %p430_p9 = scmp.ne.s32.totalorder %s651_s18, %s429_s10  ;;  %s530_s9 = smov [#allocation5]  }
  0x3e   : > { %v188_v35 = vadd.f32 %v187_v32, %v186_v33  ;;  %v200_v39 = vsub.f32 %v131_v7, %v199_v38  ;;  %v202_v40 = vstv %s196_s3  ;;  %s433_s24 = sshll.u32 %s530_s9, 4  ;;  %s434_s24 = int_to_ptr.vmem [resolvable:$false] %s433_s24 }
  0x3f   : > { %408 = vrsqrt.f32 %v162_v30  ;;  %v201_v41 = vmul.f32 %v198_v37, %v198_v37  ;;  %vm165_vm0 = vcmp.eq.f32.partialorder %v162_v30, inf  ;;  %v168_v48 = vand.u32 2147483648, %v162_v30  ;;  %p431_p10 = pnand %p430_p9, %p596_p3  ;;  %s435_s30 = scalar_lea.vmem %s434_s24, 512 }
  0x40   : > { %v204_v42 = vmul.f32 %v200_v39, %v200_v39  ;;  %v190_v43 = vadd.f32 %v189_v36, %v188_v35  ;;  %vm167_vm1 = vcmp.eq.f32.partialorder %v162_v30, 0.0  ;;  %p436_p12 = scmp.lt.s32.totalorder %s651_s18, %s434_s24  ;;  %p437_p13 = scmp.lt.s32.totalorder %s435_s30, %s429_s10 }
  0x41   : > { %v203_v44 = vadd.f32 %v202_v40, %v201_v41  ;;  %p432_p11 = pneg %p431_p10 }
  0x42   : > { %p438_p0 = por %p437_p13, %p436_p12 }
  0x43   : > { %v205_v45 = vadd.f32 %v204_v42, %v203_v44 }
  0x44   : > { %p439_p1 = pnand %p438_p0, %p432_p11 }
  0x45   : > { %v206_v46 = vmin.f32 %v190_v43, %v205_v45 }
  0x47   : > { %410 = vrsqrt.f32 %v206_v46  ;;  %vm209_vm2 = vcmp.eq.f32.partialorder %v206_v46, inf  ;;  %v212_v54 = vand.u32 2147483648, %v206_v46  ;;  %vm211_vm3 = vcmp.eq.f32.partialorder %v206_v46, 0.0 }
  0x49   : > { %v409_v47 = vpop.eup %408 }
  0x4a   : > { %v164_v49 = vmul.f32 %v409_v47, %v162_v30 }
  0x4c   : > { %v166_v50 = vsel %vm165_vm0, %v162_v30, %v164_v49 }
  0x4d   : > { %v169_v51 = vsel %vm167_vm1, %v168_v48, %v166_v50 }
  0x4e   : > { %v170_v52 = vmul.f32 2.0, %v169_v51 }
  0x50   : > { %412 = vtanh.f32 %v170_v52 }
  0x51   : > { %v411_v53 = vpop.eup %410 }
  0x52   : > { %v208_v55 = vmul.f32 %v411_v53, %v206_v46 }
  0x54   : > { %v210_v56 = vsel %vm209_vm2, %v206_v46, %v208_v55 }
  0x55   : > { %v213_v57 = vsel %vm211_vm3, %v212_v54, %v210_v56 }
  0x56   : > { %v214_v58 = vmul.f32 2.0, %v213_v57 }
  0x58   : > { %414 = vtanh.f32 %v214_v58 }
  0x5a   : > { %v413_v59 = vpop.eup %412 }
  0x5b   : > { %173 = vst.msk [vmem:[%s120_s14] sm:$0xff] %vm172_vm4, %v413_v59 }
  0x62   : > { %v415_v60 = vpop.eup %414 }
  0x63   : > { %317 = vst.msk [vmem:[%s120_s14 + $0x8] sm:$0xff] %vm172_vm4, %v415_v60 }
  0x64   : > { %442 = shalt.err (!%p439_p1)
}
  0x65   : > { %s443_s28 = scalar_lea.hbm %s656_s22, 256  ;;  %s447_s2 = scalar_lea.hbm %s711_s1, 1024 }
  0x66   : > { %p444_p2 = scmp.ne.s32.totalorder %s656_s22, %s443_s28  ;;  %p448_p6 = scmp.lt.u32.totalorder %s656_s22, %s711_s1 }
  0x67   : > { %p449_p7 = scmp.lt.u32.totalorder %s447_s2, %s443_s28  ;;  %p451_p10 = scmp.lt.u32.totalorder %s443_s28, %s656_s22 }
  0x68   : > { %p445_p4 = pnand %p444_p2, %p596_p3 }
  0x69   : > { %p450_p9 = por %p449_p7, %p448_p6 }
  0x6a   : > { %p446_p5 = pneg %p445_p4 }
  0x6b   : > { %p452_p11 = por %p451_p10, %p450_p9 }
  0x6d   : > { %p453_p12 = pnand %p452_p11, %p446_p5 }
  0x6f   : > { %456 = shalt.err (!%p453_p12)
}
  0x70   : > { %s531_s14 = smov 128   ;;  %s532_s15 = smov 256  }
  0x71   : > { %s533_s23 = smov 8  }
  0x72   : > { %327 = dma.vmem_to_hbm [thread:$0]  (%p596_p3), %s651_s18, 256, %s656_s22, %s658_s29, %s531_s14, %s532_s15, %s533_s23  }
  0x73 PF: > { %p339_p13 = scmp.ge.s32.totalorder %s527_s13, 2  ;;  %s248_s19 = sand.u32 1, %s499_s6  }
  0x74   : > { %s249_s27 = scalar_lea.sflag [#allocation3], %s248_s19 }
  0x75   : > { %p334_p0 = pnand %p339_p13, %p605_p8 }
  0x77   : > { %494 = dma.done.wait (!%p334_p0), %s249_s27, 256  }
  0x78   : > { %496 = vsyncadd (!%p334_p0), %s249_s27, 4294967040  ;;  %s15_s13 = sadd.s32 1, %s527_s13   ;;  %s716_s6 = smov %s503_s7 }
  0x79   : > { %p12_p1 = scmp.ge.s32.totalorder %s15_s13, 6   ;;  %s717_s7 = smov %s507_s8 }
  0x7a   : > { %s718_s8 = smov %s623_s26  ;;  %s719_s9 = smov %s519_s11 }
  0x7b   : > { %s720_s10 = smov %s523_s12  ;;  %s721_s11 = smov %s724_s16 }
  0x7c   : > { %s722_s12 = smov %s728_s17  ;;  %14 = sbr.rel (!%p12_p1) target bundleno = 6 (0x6), region = 62 }
  0x83   :  { %254 = vsyncpa [#allocation3], 1 }
  0x84   :  { %256 = vsyncpa [#allocation3 + $0x1], 1 }
  0x85   :  { %257 = vsyncpa [#allocation4], 1 }
  0x86   :  { %259 = vsyncpa [#allocation4 + $0x1], 1 }

</bundles_post_ra>
